<compile_context>
chip_gen: v7x
topology: tpu7x:2x2x1
jax: 0.10.0
libtpu: 0.0.40
codegen_flags: <defaults>
</compile_context>

<pallas_src>
import functools

import jax
import jax.numpy as jnp
from jax.experimental import pallas as pl
from jax.experimental.pallas import tpu as pltpu


def _round_up(n, m):
    return ((n + m - 1) // m) * m


def _scale_kernel(emb_ref, o_ref, *, scale):
    # Streaming copy + one VPU multiply in the table's native dtype.
    o_ref[...] = emb_ref[...] * scale


def _l2norm_kernel(emb_ref, o_ref, *, scale):
    # f32 only where the row reduction needs it.
    e = emb_ref[...].astype(jnp.float32)
    if scale != 1.0:
        e = e * scale
    # torch F.normalize semantics: x / max(||x||_2, eps), eps = 1e-12.
    n = jnp.sqrt(jnp.sum(e * e, axis=-1, keepdims=True))
    o_ref[...] = (e / jnp.maximum(n, 1e-12)).astype(o_ref.dtype)


def _vmem_limit_bytes(block_bytes, extra_bytes=0):
    # in + out double-buffered blocks plus in-kernel temporaries, with headroom.
    need = 4 * block_bytes + extra_bytes
    return int(min(64 << 20, max(16 << 20, 2 * need)))


def absolute_positional_embedding(x, emb_table, *, l2norm_embed=False,
                                  pos=None, seq_start_pos=None,
                                  block_bytes=1 << 20):
    """x: (B, N, ...) -- only N (= x.shape[1]) is used, as in the PyTorch module.
    emb_table: (max_seq_len, dim). Returns (N, dim) positional embeddings."""
    seq_len = x.shape[1]
    max_seq_len, dim = emb_table.shape
    assert seq_len <= max_seq_len, (
        f"sequence length {seq_len} exceeds max_seq_len {max_seq_len}")
    # TODO(synk): gather path for explicit `pos` / `seq_start_pos` not implemented.
    assert pos is None and seq_start_pos is None

    scale = 1.0 if l2norm_embed else float(dim) ** -0.5
    dtype = emb_table.dtype
    itemsize = jnp.dtype(dtype).itemsize

    # ----- lane-dense flat path: elementwise scale with dim not a multiple of
    # 128 -> view the table as a (rows, 128) slab so stores are unmasked. -----
    use_flat = (not l2norm_embed
                and dim % 128 != 0
                and (max_seq_len * dim) % 128 == 0
                and (seq_len * dim) % 128 == 0)

    if use_flat:
        lanes = 128
        r_total = (max_seq_len * dim) // lanes
        r_out = (seq_len * dim) // lanes
        row_bytes = lanes * itemsize
        tb = max(8, (block_bytes // row_bytes) // 8 * 8)
        tb = min(tb, _round_up(r_out, 8))
        grid = (pl.cdiv(r_out, tb),)
        blk_bytes = tb * lanes * itemsize

        cost = pl.CostEstimate(
            flops=seq_len * dim,
            transcendentals=0,
            bytes_accessed=2 * seq_len * dim * itemsize)

        out_flat = pl.pallas_call(
            functools.partial(_scale_kernel, scale=scale),
            out_shape=jax.ShapeDtypeStruct((r_out, lanes), dtype),
            grid=grid,
            in_specs=[pl.BlockSpec((tb, lanes), lambda i: (i, 0))],
            out_specs=pl.BlockSpec((tb, lanes), lambda i: (i, 0)),
            compiler_params=pltpu.CompilerParams(
                dimension_semantics=("parallel",),
                vmem_limit_bytes=_vmem_limit_bytes(blk_bytes)),
            cost_estimate=cost,
        )(jnp.reshape(emb_table, (r_total, lanes)))
        return jnp.reshape(out_flat, (seq_len, dim))

    # ----- standard 2-D path: (ts, dim) blocks, full dim on lanes. -----
    row_bytes = dim * itemsize
    ts = max(8, (block_bytes // row_bytes) // 8 * 8)   # byte-budget tile, mult of 8
    ts = min(ts, _round_up(seq_len, 8))
    if seq_len == max_seq_len and seq_len <= ts:
        ts = seq_len                                   # single full-extent block
    grid = (pl.cdiv(seq_len, ts),)
    blk_bytes = ts * dim * itemsize

    if l2norm_embed:
        kernel = functools.partial(_l2norm_kernel, scale=scale)
        cost = pl.CostEstimate(
            flops=4 * seq_len * dim,
            transcendentals=seq_len,
            bytes_accessed=2 * seq_len * dim * itemsize)
        extra = 2 * ts * dim * 4                       # f32 temp inside kernel
    else:
        kernel = functools.partial(_scale_kernel, scale=scale)
        cost = pl.CostEstimate(
            flops=seq_len * dim,
            transcendentals=0,
            bytes_accessed=2 * seq_len * dim * itemsize)
        extra = 0

    return pl.pallas_call(
        kernel,
        out_shape=jax.ShapeDtypeStruct((seq_len, dim), dtype),
        grid=grid,
        in_specs=[pl.BlockSpec((ts, dim), lambda i: (i, 0))],
        out_specs=pl.BlockSpec((ts, dim), lambda i: (i, 0)),
        compiler_params=pltpu.CompilerParams(
            dimension_semantics=("parallel",),
            vmem_limit_bytes=_vmem_limit_bytes(blk_bytes, extra)),
        cost_estimate=cost,
    )(emb_table)


def _reference(seq_len, emb_table, l2norm_embed=False):
    dim = emb_table.shape[1]
    scale = 1.0 if l2norm_embed else dim ** -0.5
    e = emb_table[:seq_len].astype(jnp.float32) * scale
    if l2norm_embed:
        n = jnp.sqrt(jnp.sum(e * e, axis=-1, keepdims=True))
        e = e / jnp.maximum(n, 1e-12)
    return e.astype(emb_table.dtype)


if __name__ == "__main__":
    B, N, D = 2, 8, 32
    MAX_SEQ_LEN = 16

    key = jax.random.PRNGKey(0)
    kx, ke = jax.random.split(key)
    x = jax.random.normal(kx, (B, N, D), dtype=jnp.float32)
    emb_table = jax.random.normal(ke, (MAX_SEQ_LEN, D), dtype=jnp.float32)

    # Default path (lane-dense flat kernel since D=32 < 128).
    out = absolute_positional_embedding(x, emb_table, l2norm_embed=False)
    out = jax.block_until_ready(out)
    ref = _reference(N, emb_table, l2norm_embed=False)
    assert out.shape == (N, D)
    assert jnp.allclose(out, ref, atol=1e-5, rtol=1e-5), "mismatch (default path)"

    # l2norm branch (2-D row-structured kernel).
    out2 = absolute_positional_embedding(x, emb_table, l2norm_embed=True)
    out2 = jax.block_until_ready(out2)
    ref2 = _reference(N, emb_table, l2norm_embed=True)
    assert jnp.allclose(out2, ref2, atol=1e-5, rtol=1e-5), "mismatch (l2norm path)"

    # Non-multiple-of-8 sequence length (exercises the padded partial-block path).
    x7 = x[:, :7]
    out3 = jax.block_until_ready(
        absolute_positional_embedding(x7, emb_table, l2norm_embed=False))
    ref3 = _reference(7, emb_table, l2norm_embed=False)
    assert out3.shape == (7, D)
    assert jnp.allclose(out3, ref3, atol=1e-5, rtol=1e-5), "mismatch (seq_len=7)"

    out4 = jax.block_until_ready(
        absolute_positional_embedding(x7, emb_table, l2norm_embed=True))
    ref4 = _reference(7, emb_table, l2norm_embed=True)
    assert jnp.allclose(out4, ref4, atol=1e-5, rtol=1e-5), "mismatch (l2norm, seq_len=7)"

    print("KERNEL_OK")
</pallas_src>

<mosaic_0001>
module attributes {stable_mosaic.version = 11 : i64} {
  func.func @_scale_kernel(%arg0: i32, %arg1: memref<8x128xf32, #tpu.memory_space<vmem>>, %arg2: memref<8x128xf32, #tpu.memory_space<vmem>>) attributes {dimension_semantics = [#tpu.dimension_semantics<parallel>], iteration_bounds = array<i64: 1>, scalar_prefetch = 0 : i64, scratch_operands = 0 : i64, tpu.core_type = #tpu.core_type<tc>, window_params = [{transform_indices = @transform_0, window_bounds = array<i64: 8, 128>}, {transform_indices = @transform_1, window_bounds = array<i64: 8, 128>}]} {
    %c0 = arith.constant 0 : index
    %c0_0 = arith.constant 0 : index
    %0 = vector.load %arg1[%c0, %c0_0] : memref<8x128xf32, #tpu.memory_space<vmem>>, vector<8x128xf32>
    %cst = arith.constant 0.176776692 : f32
    %1 = vector.broadcast %cst : f32 to vector<8x128xf32>
    %2 = arith.mulf %0, %1 : vector<8x128xf32>
    %c0_1 = arith.constant 0 : index
    %c0_2 = arith.constant 0 : index
    %3 = vector.load %arg2[%c0_1, %c0_2] : memref<8x128xf32, #tpu.memory_space<vmem>>, vector<8x128xf32>
    tpu.vector_store %arg2[%c0_1, %c0_2], %2 {strides = array<i32>} : memref<8x128xf32, #tpu.memory_space<vmem>>, vector<8x128xf32>,
    return
  }
  func.func @transform_0(%arg0: i32) -> (i32, i32) {
    %c0_i32 = arith.constant 0 : i32
    %c0_i32_0 = arith.constant 0 : i32
    return %arg0, %c0_i32 : i32, i32
  }
  func.func @transform_1(%arg0: i32) -> (i32, i32) {
    %c0_i32 = arith.constant 0 : i32
    %c0_i32_0 = arith.constant 0 : i32
    return %arg0, %c0_i32 : i32, i32
  }
}

</mosaic_0001>

<bundles_post_ra>
// kernel: tpu_custom_call.1
= control target key start
LH: loop header
LB: loop body
LE: loop exit
PB: predicated region body
PF: predicated region fallthrough
CT: control target
= control target key end

     0   :  { %6 = vsyncpa [#allocation3], 0  ;;  %s137_s0 = inlined_call_operand.hbm [shape: f32[4,128], index: 0, kind: input, shape index: {}]   ;;  %s138_s1 = inlined_call_operand.hbm [shape: f32[2,128], index: 1, kind: output, shape index: {}]  }
   0x1   :  { %7 = vsyncpa [#allocation4], 0 }
   0x2   :  { %12 = vsyncadd [#allocation3], 64  ;;  %s97_s6 = smov [#allocation2]   ;;  %s49_s10 = scalar_lea.hbm %s137_s0, 64 }
   0x3   :  { %s13_s7 = sshll.u32 %s97_s6, 4  ;;  %p50_p0 = scmp.ne.s32.totalorder %s137_s0, %s49_s10  ;;  %s14_s7 = int_to_ptr.vmem [resolvable:$true] %s13_s7 }
   0x4   :  { %p53_p1 = scmp.lt.u32.totalorder %s49_s10, %s137_s0 }
   0x6   :  { %p55_p2 = pnand %p53_p1, %p50_p0 }
   0x8   :  { %58 = shalt.err (!%p55_p2)
}
   0x9   :  { %s59_s15 = scalar_lea.vmem %s14_s7, 64  ;;  %s63_s16 = scalar_lea.vmem %s14_s7, 128 }
   0xa   :  { %p60_p3 = scmp.ne.s32.totalorder %s14_s7, %s59_s15  ;;  %p64_p4 = scmp.lt.s32.totalorder %s14_s7, %s14_s7 }
   0xb   :  { %p65_p5 = scmp.lt.s32.totalorder %s63_s16, %s59_s15 }
   0xd   :  { %p66_p6 = por %p65_p5, %p64_p4 }
   0xf   :  { %p67_p7 = pnand %p66_p6, %p60_p3 }
  0x11   :  { %70 = shalt.err (!%p67_p7)
}
  0x12   :  { %s98_s17 = smov 64   ;;  %s99_s18 = smov 4  }
  0x13   :  { %19 = dma.hbm_to_vmem [thread:$0]  %s137_s0, 64, %s14_s7, [#allocation3], %s98_s17, %s98_s17, %s99_s18  }
  0x14   :  { %93 = dma.done.wait [#allocation3], 128  }
  0x15   :  { %94 = vsyncadd [#allocation3], 4294967168  ;;  %v23_v0 = vld [vmem:[#allocation2] sm:$0xff] }
  0x16   :  { %v24_v1 = vmul.f32 0.17677669, %v23_v0 }
  0x18   :  { %25 = vst [vmem:[#allocation5] sm:$0xff] %v24_v1 }
  0x19   :  { %30 = vsyncadd [#allocation4], 96  ;;  %s100_s21 = smov [#allocation5]  }
  0x1a   :  { %s31_s22 = sshll.u32 %s100_s21, 4  ;;  %s32_s22 = int_to_ptr.vmem [resolvable:$true] %s31_s22 }
  0x1b   :  { %s71_s23 = scalar_lea.vmem %s32_s22, 32  ;;  %s75_s24 = scalar_lea.vmem %s32_s22, 128 }
  0x1c   :  { %p72_p8 = scmp.ne.s32.totalorder %s32_s22, %s71_s23  ;;  %p76_p9 = scmp.lt.s32.totalorder %s32_s22, %s32_s22 }
  0x1d   :  { %p77_p10 = scmp.lt.s32.totalorder %s75_s24, %s71_s23 }
  0x1f   :  { %p78_p11 = por %p77_p10, %p76_p9 }
  0x21   :  { %p79_p12 = pnand %p78_p11, %p72_p8 }
  0x23   :  { %82 = shalt.err (!%p79_p12)
}
  0x24   :  { %s83_s0 = scalar_lea.hbm %s138_s1, 32 }
  0x25   :  { %p84_p13 = scmp.ne.s32.totalorder %s138_s1, %s83_s0  ;;  %p87_p0 = scmp.lt.u32.totalorder %s83_s0, %s138_s1 }
  0x27   :  { %p89_p1 = pnand %p87_p0, %p84_p13 }
  0x29   :  { %92 = shalt.err (!%p89_p1)
}
  0x2a   :  { %s101_s2 = smov 32   ;;  %s102_s3 = smov 2  }
  0x2b   :  { %37 = dma.vmem_to_hbm [thread:$0]  %s32_s22, 32, %s138_s1, [#allocation4], %s101_s2, %s101_s2, %s102_s3  }
  0x2c   :  { %95 = dma.done.wait [#allocation4], 128  }
  0x2d   :  { %96 = vsyncadd [#allocation4], 4294967168 }
  0x2e   :  { %41 = vsyncpa [#allocation3], 1 }
  0x2f   :  { %42 = vsyncpa [#allocation4], 1 }

</bundles_post_ra>
